<compile_context>
chip_gen: v5e
topology: v5e:2x2
jax: 0.10.0
libtpu: 0.0.40
codegen_flags: <defaults>
</compile_context>

<pallas_src>
import jax
import jax.numpy as jnp
from jax.experimental import pallas as pl
from jax.experimental.pallas import tpu as pltpu


def _round_up(x, m):
    return (x + m - 1) // m * m


def ffn_kernel(x_ref, w1t_ref, b1_ref, w2t_ref, b2_ref, o_ref):
    # First linear: bf16 x bf16 -> f32 on the MXU.
    h = jnp.dot(x_ref[...], w1t_ref[...], preferred_element_type=jnp.float32)
    h = h + b1_ref[...]            # (1, d_ff) bias broadcasts over rows (f32)
    h = jnp.maximum(h, 0.0)        # ReLU in f32
    # Dropout == identity in eval mode.
    # Second linear: round ReLU output to weight dtype so MXU gets bf16 x bf16.
    y = jnp.dot(h.astype(w2t_ref.dtype), w2t_ref[...],
                preferred_element_type=jnp.float32)
    y = y + b2_ref[...]            # (1, d_model) bias (f32)
    o_ref[...] = y.astype(o_ref.dtype)


def positionwise_feed_forward(x, w1, b1, w2, b2, *, tm=256):
    """x: [B, S, d_model]; w1: [d_ff, d_model]; b1: [d_ff];
       w2: [d_model, d_ff]; b2: [d_model]  (PyTorch nn.Linear layout)."""
    B, S, d_model = x.shape
    d_ff = w1.shape[0]
    N = B * S

    # MXU/lane-friendly padded dims.
    d_model_p = _round_up(d_model, 128)
    d_ff_p = _round_up(d_ff, 128)
    TM = min(tm, _round_up(N, 16))          # multiple of 16 sublanes (bf16)
    N_p = _round_up(N, TM)

    compute_dtype = jnp.bfloat16
    out_dtype = x.dtype

    # Wrapper-side layout plumbing (done once, outside the hot loop).
    x2d = jnp.pad(x.reshape(N, d_model),
                  ((0, N_p - N), (0, d_model_p - d_model))).astype(compute_dtype)
    w1t = jnp.pad(w1.T, ((0, d_model_p - d_model), (0, d_ff_p - d_ff))).astype(compute_dtype)
    w2t = jnp.pad(w2.T, ((0, d_ff_p - d_ff), (0, d_model_p - d_model))).astype(compute_dtype)
    b1_2d = jnp.pad(b1, (0, d_ff_p - d_ff)).reshape(1, d_ff_p).astype(jnp.float32)
    b2_2d = jnp.pad(b2, (0, d_model_p - d_model)).reshape(1, d_model_p).astype(jnp.float32)

    grid = (N_p // TM,)

    # VMEM budget: resident bf16 weights + double-buffered x/out tiles + f32 h.
    weight_bytes = (w1t.size + w2t.size) * 2 + (b1_2d.size + b2_2d.size) * 4
    tile_bytes = (2 * TM * d_model_p * 2                                 # x tiles (bf16, 2x)
                  + 2 * TM * d_model_p * jnp.dtype(out_dtype).itemsize   # out tiles (2x)
                  + TM * d_ff_p * 4)                                     # f32 h intermediate
    vmem_limit = int(min(64 * 1024 * 1024,
                         max(32 * 1024 * 1024, 2 * (weight_bytes + tile_bytes))))

    flops = 2 * N_p * d_model_p * d_ff_p * 2        # two matmuls
    bytes_accessed = (x2d.size * 2 + w1t.size * 2 + w2t.size * 2
                      + b1_2d.size * 4 + b2_2d.size * 4
                      + N_p * d_model_p * jnp.dtype(out_dtype).itemsize)

    out2d = pl.pallas_call(
        ffn_kernel,
        out_shape=jax.ShapeDtypeStruct((N_p, d_model_p), out_dtype),
        grid_spec=pltpu.PrefetchScalarGridSpec(
            num_scalar_prefetch=0,
            grid=grid,
            in_specs=[
                pl.BlockSpec((TM, d_model_p), lambda i: (i, 0)),       # x tile (streamed)
                pl.BlockSpec((d_model_p, d_ff_p), lambda i: (0, 0)),   # W1^T (resident)
                pl.BlockSpec((1, d_ff_p), lambda i: (0, 0)),           # b1 (resident)
                pl.BlockSpec((d_ff_p, d_model_p), lambda i: (0, 0)),   # W2^T (resident)
                pl.BlockSpec((1, d_model_p), lambda i: (0, 0)),        # b2 (resident)
            ],
            out_specs=pl.BlockSpec((TM, d_model_p), lambda i: (i, 0)),
        ),
        compiler_params=pltpu.CompilerParams(
            dimension_semantics=("parallel",),
            vmem_limit_bytes=vmem_limit,
        ),
        cost_estimate=pl.CostEstimate(
            flops=flops, transcendentals=0, bytes_accessed=bytes_accessed),
    )(x2d, w1t, b1_2d, w2t, b2_2d)

    return out2d[:N, :d_model].reshape(B, S, d_model)


if __name__ == "__main__":
    # Small shapes consistent with the module.
    B, S, d_model, d_ff = 2, 8, 32, 64

    key = jax.random.PRNGKey(0)
    kx, k1, kb1, k2, kb2 = jax.random.split(key, 5)

    x = jax.random.normal(kx, (B, S, d_model), dtype=jnp.float32)
    # Deterministic synthetic parameters (nn.Linear-like scale).
    w1 = jax.random.normal(k1, (d_ff, d_model), dtype=jnp.float32) * (1.0 / d_model ** 0.5)
    b1 = jax.random.normal(kb1, (d_ff,), dtype=jnp.float32) * 0.01
    w2 = jax.random.normal(k2, (d_model, d_ff), dtype=jnp.float32) * (1.0 / d_ff ** 0.5)
    b2 = jax.random.normal(kb2, (d_model,), dtype=jnp.float32) * 0.01

    out = positionwise_feed_forward(x, w1, b1, w2, b2)
    out = jax.block_until_ready(out)

    # Pure-JAX f32 reference (eval-mode dropout == identity).  Kernel computes
    # in bf16 on the MXU, so tolerance is loosened accordingly.
    ref = jnp.maximum(
        jnp.dot(x, w1.T, precision=jax.lax.Precision.HIGHEST) + b1, 0.0)
    ref = jnp.dot(ref, w2.T, precision=jax.lax.Precision.HIGHEST) + b2

    assert out.shape == (B, S, d_model)
    max_err = float(jnp.max(jnp.abs(out - ref)))
    assert max_err < 1e-1, f"mismatch vs reference, max abs err = {max_err}"

    print("KERNEL_OK")
</pallas_src>

<mosaic_0001>
module attributes {stable_mosaic.version = 11 : i64} {
  func.func @ffn_kernel(%arg0: i32, %arg1: memref<16x128xbf16, #tpu.memory_space<vmem>>, %arg2: memref<128x128xbf16, #tpu.memory_space<vmem>>, %arg3: memref<1x128xf32, #tpu.memory_space<vmem>>, %arg4: memref<128x128xbf16, #tpu.memory_space<vmem>>, %arg5: memref<1x128xf32, #tpu.memory_space<vmem>>, %arg6: memref<16x128xf32, #tpu.memory_space<vmem>>) attributes {dimension_semantics = [#tpu.dimension_semantics<parallel>], iteration_bounds = array<i64: 1>, scalar_prefetch = 0 : i64, scratch_operands = 0 : i64, tpu.core_type = #tpu.core_type<tc>, window_params = [{transform_indices = @transform_0, window_bounds = array<i64: 16, 128>}, {pipeline_mode = #tpu.pipeline_mode<synchronous>, transform_indices = @transform_1, window_bounds = array<i64: 128, 128>}, {pipeline_mode = #tpu.pipeline_mode<synchronous>, transform_indices = @transform_2, window_bounds = array<i64: 1, 128>}, {pipeline_mode = #tpu.pipeline_mode<synchronous>, transform_indices = @transform_3, window_bounds = array<i64: 128, 128>}, {pipeline_mode = #tpu.pipeline_mode<synchronous>, transform_indices = @transform_4, window_bounds = array<i64: 1, 128>}, {transform_indices = @transform_5, window_bounds = array<i64: 16, 128>}]} {
    %c0 = arith.constant 0 : index
    %c0_0 = arith.constant 0 : index
    %0 = vector.load %arg1[%c0, %c0_0] : memref<16x128xbf16, #tpu.memory_space<vmem>>, vector<16x128xbf16>
    %c0_1 = arith.constant 0 : index
    %c0_2 = arith.constant 0 : index
    %1 = vector.load %arg2[%c0_1, %c0_2] : memref<128x128xbf16, #tpu.memory_space<vmem>>, vector<128x128xbf16>
    %cst = arith.constant dense<0.000000e+00> : vector<16x128xf32>
    %2 = tpu.matmul %0, %1, %cst {dimension_numbers = #tpu.dot_dimension_numbers<[1], [0], [0], [1], [0, 0, 1, 1], [], []>} : vector<16x128xbf16>, vector<128x128xbf16>, vector<16x128xf32> -> vector<16x128xf32>
    %c0_3 = arith.constant 0 : index
    %c0_4 = arith.constant 0 : index
    %3 = vector.load %arg3[%c0_3, %c0_4] : memref<1x128xf32, #tpu.memory_space<vmem>>, vector<1x128xf32>
    %4 = vector.broadcast %3 : vector<1x128xf32> to vector<16x128xf32>
    %5 = arith.addf %2, %4 : vector<16x128xf32>
    %cst_5 = arith.constant 0.000000e+00 : f32
    %6 = vector.broadcast %cst_5 : f32 to vector<16x128xf32>
    %7 = arith.maximumf %5, %6 : vector<16x128xf32>
    %8 = arith.truncf %7 : vector<16x128xf32> to vector<16x128xbf16>
    %c0_6 = arith.constant 0 : index
    %c0_7 = arith.constant 0 : index
    %9 = vector.load %arg4[%c0_6, %c0_7] : memref<128x128xbf16, #tpu.memory_space<vmem>>, vector<128x128xbf16>
    %cst_8 = arith.constant dense<0.000000e+00> : vector<16x128xf32>
    %10 = tpu.matmul %8, %9, %cst_8 {dimension_numbers = #tpu.dot_dimension_numbers<[1], [0], [0], [1], [0, 0, 1, 1], [], []>} : vector<16x128xbf16>, vector<128x128xbf16>, vector<16x128xf32> -> vector<16x128xf32>
    %c0_9 = arith.constant 0 : index
    %c0_10 = arith.constant 0 : index
    %11 = vector.load %arg5[%c0_9, %c0_10] : memref<1x128xf32, #tpu.memory_space<vmem>>, vector<1x128xf32>
    %12 = vector.broadcast %11 : vector<1x128xf32> to vector<16x128xf32>
    %13 = arith.addf %10, %12 : vector<16x128xf32>
    %c0_11 = arith.constant 0 : index
    %c0_12 = arith.constant 0 : index
    %14 = vector.load %arg6[%c0_11, %c0_12] : memref<16x128xf32, #tpu.memory_space<vmem>>, vector<16x128xf32>
    tpu.vector_store %arg6[%c0_11, %c0_12], %13 {strides = array<i32>} : memref<16x128xf32, #tpu.memory_space<vmem>>, vector<16x128xf32>,
    return
  }
  func.func @transform_0(%arg0: i32) -> (i32, i32) {
    %c0_i32 = arith.constant 0 : i32
    %c0_i32_0 = arith.constant 0 : i32
    return %arg0, %c0_i32 : i32, i32
  }
  func.func @transform_1(%arg0: i32) -> (i32, i32) {
    %c0_i32 = arith.constant 0 : i32
    %c0_i32_0 = arith.constant 0 : i32
    %c0_i32_1 = arith.constant 0 : i32
    return %c0_i32, %c0_i32_0 : i32, i32
  }
  func.func @transform_2(%arg0: i32) -> (i32, i32) {
    %c0_i32 = arith.constant 0 : i32
    %c0_i32_0 = arith.constant 0 : i32
    %c0_i32_1 = arith.constant 0 : i32
    return %c0_i32, %c0_i32_0 : i32, i32
  }
  func.func @transform_3(%arg0: i32) -> (i32, i32) {
    %c0_i32 = arith.constant 0 : i32
    %c0_i32_0 = arith.constant 0 : i32
    %c0_i32_1 = arith.constant 0 : i32
    return %c0_i32, %c0_i32_0 : i32, i32
  }
  func.func @transform_4(%arg0: i32) -> (i32, i32) {
    %c0_i32 = arith.constant 0 : i32
    %c0_i32_0 = arith.constant 0 : i32
    %c0_i32_1 = arith.constant 0 : i32
    return %c0_i32, %c0_i32_0 : i32, i32
  }
  func.func @transform_5(%arg0: i32) -> (i32, i32) {
    %c0_i32 = arith.constant 0 : i32
    %c0_i32_0 = arith.constant 0 : i32
    return %arg0, %c0_i32 : i32, i32
  }
}

</mosaic_0001>

<bundles_post_ra>
// kernel: tpu_custom_call.1
= control target key start
LH: loop header
LB: loop body
LE: loop exit
PB: predicated region body
PF: predicated region fallthrough
CT: control target
= control target key end

     0   :  { %10 = vsyncpa [#allocation3], 0  ;;  %s518_s0 = inlined_call_operand.hbm [shape: bf16[16,128], index: 0, kind: input, shape index: {}]   ;;  %s519_s1 = inlined_call_operand.hbm [shape: bf16[128,128], index: 1, kind: input, shape index: {}]   ;;  %s520_s2 = inlined_call_operand.vmem [shape: f32[1,128], index: 2, kind: input, shape index: {}]   ;;  %s521_s3 = inlined_call_operand.hbm [shape: bf16[128,128], index: 3, kind: input, shape index: {}]   ;;  %s522_s4 = inlined_call_operand.vmem [shape: f32[1,128], index: 4, kind: input, shape index: {}]   ;;  %s523_s5 = inlined_call_operand.hbm [shape: f32[16,128], index: 5, kind: output, shape index: {}]  }
   0x1   :  { %11 = vsyncpa [#allocation6], 0 }
   0x2   :  { %12 = vsyncpa [#allocation4], 0  ;;  %s30_s20 = sshll.u32 %s519_s1, 4  ;;  %s462_s21 = smov [#allocation5]   ;;  %s31_s20 = int_to_ptr.hbm [resolvable:$true] %s30_s20 }
   0x3   :  { %s32_s22 = sshll.u32 %s462_s21, 4  ;;  %s17_s25 = sshll.u32 %s518_s0, 4  ;;  %s33_s22 = int_to_ptr.vmem [resolvable:$true] %s32_s22  ;;  %s18_s25 = int_to_ptr.hbm [resolvable:$true] %s17_s25 }
   0x4   :  { %s463_s26 = smov 64   ;;  %s464_s27 = smov 4  }
   0x5   :  { %38 = dma.hbm_to_vmem [thread:$0]  %s31_s20, 1024, %s33_s22, [#allocation6], %s463_s26, %s463_s26, %s464_s27  }
   0x6   :  { %s465_s28 = smov [#allocation2]   ;;  %s45_s7 = sshll.u32 %s521_s3, 4  ;;  %s46_s7 = int_to_ptr.hbm [resolvable:$true] %s45_s7 }
   0x7   :  { %s19_s29 = sshll.u32 %s465_s28, 4  ;;  %s466_s1 = smov [#allocation7]   ;;  %s20_s29 = int_to_ptr.vmem [resolvable:$true] %s19_s29 }
   0x8   :  { %25 = dma.hbm_to_vmem [thread:$0]  %s18_s25, 128, %s20_s29, [#allocation3], %s463_s26, %s463_s26, %s464_s27  }
   0x9   :  { %s47_s8 = sshll.u32 %s466_s1, 4  ;;  %s48_s8 = int_to_ptr.vmem [resolvable:$true] %s47_s8 }
   0xa   :  { %53 = dma.hbm_to_vmem [thread:$0]  %s46_s7, 1024, %s48_s8, [#allocation6], %s463_s26, %s463_s26, %s464_s27  }
   0xb   :  { %456 = dma.done.wait [#allocation3], 128  }
   0xc   :  { %457 = vsyncadd [#allocation3], 4294967168 }
   0xd   :  { %458 = dma.done.wait [#allocation6], 2048  }
   0xe   :  { %459 = vsyncadd [#allocation6], 4294965248  ;;  %v341_v0 = vld [vmem:[#allocation5 + $0x38] sm:$0xff]  ;;  %v340_v1 = vld [vmem:[#allocation5 + $0x30] sm:$0xff]  ;;  %s467_s11 = smov [#allocation8]   ;;  %s468_s15 = smov 128  }
   0xf   :  { %144 = vmatpush.bf16.msra.mxu0 %v341_v0  ;;  %v349_v2 = vld [vmem:[#allocation7 + $0x38] sm:$0xff]  ;;  %v348_v3 = vld [vmem:[#allocation7 + $0x30] sm:$0xff]  ;;  %v339_v4 = vld [vmem:[#allocation5 + $0x28] sm:$0xff]  ;;  %s249_s12 = sshll.u32 %s467_s11, 4  ;;  %s469_s16 = smov 8   ;;  %s250_s12 = int_to_ptr.vmem [resolvable:$true] %s249_s12 }
  0x10   :  { %229 = vmatpush.bf16.msra.mxu1 %v349_v2  ;;  %v347_v5 = vld [vmem:[#allocation7 + $0x28] sm:$0xff]  ;;  %v338_v6 = vld [vmem:[#allocation5 + $0x20] sm:$0xff]  ;;  %v337_v8 = vld [vmem:[#allocation5 + $0x18] sm:$0xff] }
  0x11   :  { %v346_v7 = vld [vmem:[#allocation7 + $0x20] sm:$0xff]  ;;  %v336_v9 = vld [vmem:[#allocation5 + $0x10] sm:$0xff]  ;;  %v335_v10 = vld [vmem:[#allocation5 + $0x8] sm:$0xff] }
  0x12   :  { %v334_v11 = vld [vmem:[#allocation5] sm:$0xff]  ;;  %v333_v12 = vld [vmem:[#allocation2] sm:$0xff]  ;;  %v344_v14 = vld [vmem:[#allocation7 + $0x10] sm:$0xff] }
  0x13   :  { %145 = vmatpush.bf16.msra.mxu0 %v340_v1  ;;  %v345_v13 = vld [vmem:[#allocation7 + $0x18] sm:$0xff]  ;;  %v343_v15 = vld [vmem:[#allocation7 + $0x8] sm:$0xff]  ;;  %v342_v16 = vld [vmem:[#allocation7] sm:$0xff] }
  0x14   :  { %230 = vmatpush.bf16.msra.mxu1 %v348_v3  ;;  %v358_v18 = vld [vmem:[%s520_s2] ss:$0 sm:$0xff]  ;;  %s251_s2 = sshll.u32 %s523_s5, 4  ;;  %s252_s2 = int_to_ptr.hbm [resolvable:$true] %s251_s2 }
  0x15   :  { %v359_v25 = vld [vmem:[%s522_s4] ss:$0 sm:$0xff] }
  0x17   :  { %146 = vmatpush.bf16.msra.mxu0 %v339_v4 }
  0x18   :  { %231 = vmatpush.bf16.msra.mxu1 %v347_v5 }
  0x1b   :  { %147 = vmatpush.bf16.msra.mxu0 %v338_v6 }
  0x1c   :  { %232 = vmatpush.bf16.msra.mxu1 %v346_v7 }
  0x1f   :  { %148 = vmatpush.bf16.msra.mxu0 %v337_v8 }
  0x20   :  { %233 = vmatpush.bf16.msra.mxu1 %v345_v13 }
  0x23   :  { %149 = vmatpush.bf16.msra.mxu0 %v336_v9 }
  0x24   :  { %234 = vmatpush.bf16.msra.mxu1 %v344_v14 }
  0x27   :  { %150 = vmatpush.bf16.msra.mxu0 %v335_v10 }
  0x28   :  { %235 = vmatpush.bf16.msra.mxu1 %v343_v15 }
  0x2b   :  { %151 = vmatpush.bf16.msra.mxu0 %v334_v11 }
  0x2c   :  { %236 = vmatpush.bf16.msra.mxu1 %v342_v16 }
  0x2e   :  { %152 = vmatmul.bf16.vlgmr.msra.gmra.mxu0 %v333_v12 }
  0xab   :  { %v153_v17 = vpop.f32.mrf.mxu0 }
  0xac   :  { %v154_v19 = vadd.f32 %v358_v18, %v153_v17 }
  0xae   :  { %v158_v22 = vmax.f32 %v154_v19, 0.0 }
  0xb3   :  { %v155_v20 = vpop.f32.mrf.mxu0 }
  0xb4   :  { %v156_v21 = vadd.f32 %v358_v18, %v155_v20 }
  0xb6   :  { %v159_v23 = vmax.f32 %v156_v21, 0.0 }
  0xb8   :  { %v160_v24 = vpack.c.bf16 %v159_v23, %v158_v22 }
  0xba   :  { %237 = vmatmul.bf16.vlgmr.msra.gmra.mxu1 %v160_v24 }
 0x137   :  { %v238_v26 = vpop.f32.mrf.mxu1 }
 0x138   :  { %v239_v27 = vadd.f32 %v359_v25, %v238_v26 }
 0x13a   :  { %243 = vst [vmem:[#allocation8] sm:$0xff] %v239_v27 }
 0x13f   :  { %v240_v28 = vpop.f32.mrf.mxu1 }
 0x140   :  { %v241_v29 = vadd.f32 %v359_v25, %v240_v28 }
 0x142   :  { %244 = vst [vmem:[#allocation8 + $0x8] sm:$0xff] %v241_v29 }
 0x143   :  { %257 = dma.vmem_to_hbm [thread:$0]  %s250_s12, 256, %s252_s2, [#allocation4], %s468_s15, %s468_s15, %s469_s16  }
 0x144   :  { %460 = dma.done.wait [#allocation4], 256  }
 0x145   :  { %461 = vsyncadd [#allocation4], 4294967040 }
 0x146   :  { %262 = vsyncpa [#allocation3], 1 }
 0x147   :  { %263 = vsyncpa [#allocation6], 1 }
 0x148   :  { %264 = vsyncpa [#allocation4], 1 }

</bundles_post_ra>
